<compile_context>
chip_gen: v5e
topology: v5e:2x2
jax: 0.10.0
libtpu: 0.0.40
codegen_flags: <defaults>
</compile_context>

<pallas_src>
import jax
import jax.numpy as jnp
from jax.experimental import pallas as pl
from jax.experimental.pallas import tpu as pltpu

_LANES = 128                # vreg lane width; output last dim stays lane-dense
_ROW_TILE = 2048            # max rows per grid step -> 1 MiB f32 tile
_SINGLE_BLOCK_ROWS = 512    # <= ~256 KiB slab: one full-extent block, grid of 1
_TINY_ELEMS = 8 * _LANES    # below ~8 lane-rows, plain JAX beats a kernel launch


def _scale_kernel(w_ref, x_ref, o_ref):
    # w_ref: (1, 1) scalar weight in SMEM.
    # x_ref / o_ref: lane-dense (tile_rows, 128) slab in VMEM.
    # One vld + one VPU vmul + one unmasked vst -- no MXU, no masked stores.
    o_ref[...] = (x_ref[...] * w_ref[0, 0]).astype(o_ref.dtype)


def _round_up(v, m):
    return ((v + m - 1) // m) * m


def actor_net_forward(x, weight):
    """Pallas equivalent of ActorNet.forward.

    Args:
      x:      (batch, 1) float32
      weight: (1, 1) float32  -- PyTorch nn.Linear(1, 1, bias=False) weight

    Returns:
      (batch, 1) float32, equal to x @ weight.T
    """
    if x.ndim != 2 or x.shape[1] != 1:
        raise ValueError(f"expected (batch, 1) input, got {x.shape}")
    if weight.shape != (1, 1):
        raise ValueError(f"expected (1, 1) weight, got {weight.shape}")
    b = x.shape[0]

    flat = x.reshape(-1)
    n = flat.shape[0]

    # Tiny batch: fixed pallas_call launch cost dominates a single fused
    # scalar multiply, so stay in plain JAX (identical math).
    if n < _TINY_ELEMS:
        return (flat * weight[0, 0]).reshape(b, 1)

    # Lane-dense (rows, 128) slab; pad only to the next lane-row (<= 127
    # elements), never to a grid multiple.
    rows = pl.cdiv(n, _LANES)
    padded = rows * _LANES
    needs_pad = padded != n
    if needs_pad:
        flat = jnp.pad(flat, (0, padded - n))
    slab = flat.reshape(rows, _LANES)
    w_smem = weight.reshape(1, 1)           # scalar weight, no transpose

    if rows <= _SINGLE_BLOCK_ROWS:
        # Small slab: single full-extent block (legal for any row count).
        tile_rows = rows
    else:
        # At least 2 "parallel" steps (feeds both v7x TCs), tile capped at
        # 1 MiB, tile rows a multiple of 8 so the (8, 128) constraint holds.
        # The ragged last block is handled by Pallas -- no grid padding.
        tile_rows = min(_ROW_TILE, _round_up(pl.cdiv(rows, 2), 8))
    num_tiles = pl.cdiv(rows, tile_rows)

    out = pl.pallas_call(
        _scale_kernel,
        out_shape=jax.ShapeDtypeStruct((rows, _LANES), x.dtype),
        grid=(num_tiles,),
        in_specs=[
            pl.BlockSpec(memory_space=pltpu.MemorySpace.SMEM),
            pl.BlockSpec((tile_rows, _LANES), lambda i: (i, 0)),
        ],
        out_specs=pl.BlockSpec((tile_rows, _LANES), lambda i: (i, 0)),
        compiler_params=pltpu.CompilerParams(
            dimension_semantics=("parallel",)),
        # When a fresh padded slab was created, write the result in place
        # instead of allocating another HBM slab of the same size.
        input_output_aliases={1: 0} if needs_pad else {},
    )(w_smem, slab)

    if needs_pad:
        return out.reshape(-1)[:n].reshape(b, 1)
    return out.reshape(b, 1)


if __name__ == "__main__":
    key = jax.random.PRNGKey(0)
    k_w, k1, k2, k3 = jax.random.split(key, 4)

    # Deterministic synthetic parameter (matches nn.Linear(1, 1, bias=False)).
    weight = jax.random.uniform(
        k_w, (1, 1), dtype=jnp.float32, minval=-1.0, maxval=1.0
    )

    test_inputs = [
        jax.random.normal(k1, (8, 1), dtype=jnp.float32),     # tiny -> JAX bypass
        jax.random.normal(k2, (2048, 1), dtype=jnp.float32),  # Pallas, lane-divisible
        jax.random.normal(k3, (2000, 1), dtype=jnp.float32),  # Pallas, ragged + pad
    ]

    for x in test_inputs:
        y = actor_net_forward(x, weight)
        jax.block_until_ready(y)
        y_ref = x @ weight.T                 # same semantics as PyTorch x @ W^T
        if y.shape != y_ref.shape:
            raise AssertionError(f"shape mismatch: {y.shape} vs {y_ref.shape}")
        if not jnp.allclose(y, y_ref, atol=1e-6):
            raise AssertionError("mismatch vs reference")

    print("KERNEL_OK")
</pallas_src>

<mosaic_0001>
module attributes {stable_mosaic.version = 11 : i64} {
  func.func @_scale_kernel(%arg0: i32, %arg1: memref<1x1xf32, #tpu.memory_space<smem>>, %arg2: memref<16x128xf32, #tpu.memory_space<vmem>>, %arg3: memref<16x128xf32, #tpu.memory_space<vmem>>) attributes {dimension_semantics = [#tpu.dimension_semantics<parallel>], iteration_bounds = array<i64: 1>, scalar_prefetch = 0 : i64, scratch_operands = 0 : i64, tpu.core_type = #tpu.core_type<tc>, window_params = [{transform_indices = @transform_0, window_bounds = array<i64: 1, 1>}, {transform_indices = @transform_1, window_bounds = array<i64: 16, 128>}, {transform_indices = @transform_2, window_bounds = array<i64: 16, 128>}]} {
    %c0 = arith.constant 0 : index
    %c0_0 = arith.constant 0 : index
    %0 = vector.load %arg2[%c0, %c0_0] : memref<16x128xf32, #tpu.memory_space<vmem>>, vector<16x128xf32>
    %c0_1 = arith.constant 0 : index
    %c0_2 = arith.constant 0 : index
    %1 = memref.load %arg1[%c0_1, %c0_2] : memref<1x1xf32, #tpu.memory_space<smem>>
    %2 = vector.broadcast %1 : f32 to vector<16x128xf32>
    %3 = arith.mulf %0, %2 : vector<16x128xf32>
    %c0_3 = arith.constant 0 : index
    %c0_4 = arith.constant 0 : index
    %4 = vector.load %arg3[%c0_3, %c0_4] : memref<16x128xf32, #tpu.memory_space<vmem>>, vector<16x128xf32>
    tpu.vector_store %arg3[%c0_3, %c0_4], %3 {strides = array<i32>} : memref<16x128xf32, #tpu.memory_space<vmem>>, vector<16x128xf32>,
    return
  }
  func.func @transform_0(%arg0: i32) -> (i32, i32) {
    %c0_i32 = arith.constant 0 : i32
    %c0_i32_0 = arith.constant 0 : i32
    %c0_i32_1 = arith.constant 0 : i32
    return %c0_i32, %c0_i32_0 : i32, i32
  }
  func.func @transform_1(%arg0: i32) -> (i32, i32) {
    %c0_i32 = arith.constant 0 : i32
    %c0_i32_0 = arith.constant 0 : i32
    return %arg0, %c0_i32 : i32, i32
  }
  func.func @transform_2(%arg0: i32) -> (i32, i32) {
    %c0_i32 = arith.constant 0 : i32
    %c0_i32_0 = arith.constant 0 : i32
    return %arg0, %c0_i32 : i32, i32
  }
}

</mosaic_0001>

<bundles_post_ra>
// kernel: tpu_custom_call.1
= control target key start
LH: loop header
LB: loop body
LE: loop exit
PB: predicated region body
PF: predicated region fallthrough
CT: control target
= control target key end

     0   :  { %8 = vsyncpa [#allocation4], 0  ;;  %s140_s0 = inlined_call_operand.<no memory space> [shape: f32[1,1], index: 0, kind: input, shape index: {}]   ;;  %s141_s1 = inlined_call_operand.hbm [shape: f32[16,128], index: 1, kind: input, shape index: {}]   ;;  %s142_s2 = inlined_call_operand.hbm [shape: f32[16,128], index: 2, kind: output, shape index: {}]  }
   0x1   :  { %9 = vsyncpa [#allocation5], 0  ;;  %s16_s11 = sshll.u32 %s141_s1, 4  ;;  %s112_s12 = smov [#allocation3]   ;;  %s17_s11 = int_to_ptr.hbm [resolvable:$true] %s16_s11 }
   0x2   :  { %s18_s13 = sshll.u32 %s112_s12, 4  ;;  %s113_s14 = smov 128   ;;  %s19_s13 = int_to_ptr.vmem [resolvable:$true] %s18_s13 }
   0x3   :  { %s114_s15 = smov 8  }
   0x4   :  { %24 = dma.hbm_to_vmem [thread:$0]  %s17_s11, 256, %s19_s13, [#allocation4], %s113_s14, %s113_s14, %s114_s15  }
   0x5   :  { %108 = dma.done.wait [#allocation4], 256  }
   0x6   :  { %109 = vsyncadd [#allocation4], 4294967040  ;;  %v32_v0 = vstv %s140_s0  ;;  %s115_s18 = smov [#allocation6]   ;;  %s43_s22 = sshll.u32 %s142_s2, 4  ;;  %v29_v1 = vld [vmem:[#allocation3] sm:$0xff]  ;;  %v30_v2 = vld [vmem:[#allocation3 + $0x8] sm:$0xff]  ;;  %s44_s22 = int_to_ptr.hbm [resolvable:$true] %s43_s22 }
   0x7   :  { %s41_s19 = sshll.u32 %s115_s18, 4  ;;  %v33_v3 = vmul.f32 %v32_v0, %v29_v1  ;;  %v34_v4 = vmul.f32 %v32_v0, %v30_v2  ;;  %s42_s19 = int_to_ptr.vmem [resolvable:$true] %s41_s19 }
   0x9   :  { %35 = vst [vmem:[#allocation6] sm:$0xff] %v33_v3 }
   0xa   :  { %36 = vst [vmem:[#allocation6 + $0x8] sm:$0xff] %v34_v4 }
   0xb   :  { %49 = dma.vmem_to_hbm [thread:$0]  %s42_s19, 256, %s44_s22, [#allocation5], %s113_s14, %s113_s14, %s114_s15  }
   0xc   :  { %110 = dma.done.wait [#allocation5], 256  }
   0xd   :  { %111 = vsyncadd [#allocation5], 4294967040 }
   0xe   :  { %54 = vsyncpa [#allocation4], 1 }
   0xf   :  { %55 = vsyncpa [#allocation5], 1 }

</bundles_post_ra>
